<compile_context>
chip_gen: v7x
topology: tpu7x:2x2x1
jax: 0.10.0
libtpu: 0.0.40
codegen_flags: <defaults>
</compile_context>

<pallas_src>
import jax
import jax.numpy as jnp
from jax.experimental import pallas as pl
from jax.experimental.pallas import tpu as pltpu


def _mlp_kernel(x_ref, w1_ref, b1_ref, w2_ref, b2_ref, w3_ref, b3_ref, o_ref):
    # Layer 1: (TB, D) @ (D, 32) + (1, 32) -> ReLU   (f32 accumulation on MXU)
    h1 = jnp.dot(x_ref[...], w1_ref[...], preferred_element_type=jnp.float32)
    h1 = jnp.maximum(h1 + b1_ref[...], 0.0)
    # Layer 2: (TB, 32) @ (32, 16) + (1, 16) -> ReLU
    h2 = jnp.dot(h1, w2_ref[...], preferred_element_type=jnp.float32)
    h2 = jnp.maximum(h2 + b2_ref[...], 0.0)
    # Layer 3: Linear(16, 1).  Contract the (1,16) weight row against h2
    # ((TB,16), contracting dim 1 of both) so the logits come out as a
    # lane-dense (1, TB) row instead of a 1-wide column (no masked stores).
    logit = jax.lax.dot_general(
        w3_ref[...], h2,
        dimension_numbers=(((1,), (1,)), ((), ())),
        preferred_element_type=jnp.float32,
    ) + b3_ref[...]                                   # (1, TB)
    o_ref[...] = jax.nn.sigmoid(logit).reshape(o_ref.shape).astype(o_ref.dtype)


def _round_up(n, m):
    return ((n + m - 1) // m) * m


def _choose_tile(B, tile_b):
    """Pick the batch-tile size.

    - Large B: use tile_b (big tiles amortize the ~0.35us per-grid-step cost
      and keep each x DMA >= ~1 MiB).
    - 1024 < B <= tile_b: split into >= 2 grid steps so the 'parallel' batch
      axis can shard across v7x's two TensorCores (no-op on v5e/v6e).
    - Small B: single grid step, block == full array (no (8,128) issue since
      block dims equal the array dims).
    """
    if B > tile_b:
        return tile_b
    if B > 1024:
        return min(tile_b, _round_up((B + 1) // 2, 256))
    return B


def divorce_predictor_forward(x, params, *, tile_b=4096):
    """Fused MLP forward.  x: (B, input_dim) float32 or bfloat16.

    Returns (B, 1) float32.

    tile_b: batch rows per grid step.  4096 is a good f32 default on all
            generations; use 8192-16384 when the caller supplies bf16 x
            (v6e/v7x).  No host-side padding or dtype casting of x is done
            here -- callers wanting the bf16 bandwidth win must pass bf16 x.
    """
    w1, b1, w2, b2, w3, b3 = params
    B, D = x.shape

    # Only the tiny first-layer weight is matched to x's dtype (so bf16 x gets
    # the bf16 MXU path); accumulation stays f32 inside the kernel.
    if w1.dtype != x.dtype:
        w1 = w1.astype(x.dtype)

    tile = _choose_tile(B, tile_b)
    num_tiles = (B + tile - 1) // tile          # ragged tail handled by Pallas
    rows_computed = num_tiles * tile            # includes garbage tail rows

    def full(a):
        # Whole (small) parameter array resident every grid step.
        return pl.BlockSpec(a.shape, lambda i: (0,) * a.ndim)

    param_bytes = sum(int(p.size) * p.dtype.itemsize
                      for p in (w1, b1, w2, b2, w3, b3))
    cost = pl.CostEstimate(
        flops=2 * rows_computed * (D * 32 + 32 * 16 + 16),
        transcendentals=rows_computed,
        bytes_accessed=int(x.size) * x.dtype.itemsize + param_bytes
                       + rows_computed * 4,
    )

    out = pl.pallas_call(
        _mlp_kernel,
        out_shape=jax.ShapeDtypeStruct((num_tiles, 1, tile), jnp.float32),
        grid_spec=pltpu.PrefetchScalarGridSpec(
            num_scalar_prefetch=0,
            grid=(num_tiles,),
            in_specs=[
                # x tiled over batch; last block may be partial (bounded read,
                # unspecified values in the OOB region -> sliced-off rows).
                pl.BlockSpec((tile, D), lambda i: (i, 0)),
                full(w1), full(b1),
                full(w2), full(b2),
                full(w3), full(b3),
            ],
            # Lane-dense output: block (1, 1, tile), last two dims == array dims.
            out_specs=pl.BlockSpec((1, 1, tile), lambda i: (i, 0, 0)),
        ),
        compiler_params=pltpu.CompilerParams(
            dimension_semantics=("parallel",),
            # Large tiles need more than v5e's 16 MiB default scoped VMEM;
            # 48 MiB stays under v7x's 64 MiB physical VMEM.
            vmem_limit_bytes=48 * 1024 * 1024,
        ),
        cost_estimate=cost,
    )(x, w1, b1, w2, b2, w3, b3)

    # (num_tiles, 1, tile) -> (rows_computed, 1) -> drop tail-garbage rows.
    # NOTE: rows >= B of the raw kernel output are undefined; never use them.
    return out.reshape(rows_computed, 1)[:B]


def init_params(key, input_dim):
    """PyTorch-style init U(-1/sqrt(fan_in), 1/sqrt(fan_in)).

    w1, w2 stored as (in, out) so the kernel computes x @ W; w3 stored in
    PyTorch's (out=1, in=16) row layout so the final layer contracts to a
    lane-dense logit row.  Biases stored as (1, out).
    """
    specs = [(input_dim, 32), (32, 16), (16, 1)]
    params = []
    for i, (fan_in, fan_out) in enumerate(specs):
        kw, kb = jax.random.split(jax.random.fold_in(key, i))
        bound = 1.0 / jnp.sqrt(float(fan_in))
        if fan_out == 1:
            w = jax.random.uniform(kw, (fan_out, fan_in), jnp.float32, -bound, bound)
        else:
            w = jax.random.uniform(kw, (fan_in, fan_out), jnp.float32, -bound, bound)
        b = jax.random.uniform(kb, (1, fan_out), jnp.float32, -bound, bound)
        params += [w, b]
    return tuple(params)


def reference_forward(x, params):
    w1, b1, w2, b2, w3, b3 = params
    x = x.astype(jnp.float32)
    h = jnp.maximum(x @ w1 + b1, 0.0)
    h = jnp.maximum(h @ w2 + b2, 0.0)
    return jax.nn.sigmoid(h @ w3.T + b3)


if __name__ == "__main__":
    key = jax.random.PRNGKey(0)
    input_dim = 54          # classic divorce-predictors dataset width

    kx, kp, kx2 = jax.random.split(key, 3)
    params = init_params(kp, input_dim)

    # 1) Small batch (single grid step path, block == full array).
    x_small = jax.random.normal(kx, (8, input_dim), dtype=jnp.float32)
    out_small = jax.block_until_ready(divorce_predictor_forward(x_small, params))
    ref_small = reference_forward(x_small, params)
    assert out_small.shape == (8, 1)
    assert jnp.allclose(out_small, ref_small, atol=1e-5, rtol=1e-5), "small-batch mismatch"

    # 2) Multi-tile ragged batch: 3 tiles of 128, partial tail handled by
    #    Pallas' bounded last-block read (no host-side jnp.pad of x).
    x_big = jax.random.normal(kx2, (300, input_dim), dtype=jnp.float32)
    out_big = jax.block_until_ready(
        divorce_predictor_forward(x_big, params, tile_b=128))
    ref_big = reference_forward(x_big, params)
    assert out_big.shape == (300, 1)
    assert jnp.allclose(out_big, ref_big, atol=1e-5, rtol=1e-5), "tiled-batch mismatch"

    # 3) Caller-supplied bf16 x (stands in for an upstream bf16 producer):
    #    no wrapper-side cast, halved x HBM traffic; looser tolerance.
    x_bf16 = x_big.astype(jnp.bfloat16)
    out_bf16 = jax.block_until_ready(
        divorce_predictor_forward(x_bf16, params, tile_b=128))
    ref_bf16 = reference_forward(x_bf16, params)
    assert out_bf16.shape == (300, 1)
    assert jnp.allclose(out_bf16, ref_bf16, atol=3e-2, rtol=3e-2), "bf16 path mismatch"

    print("KERNEL_OK")
</pallas_src>

<mosaic_0001>
module attributes {stable_mosaic.version = 11 : i64} {
  func.func @_mlp_kernel(%arg0: i32, %arg1: memref<8x54xf32, #tpu.memory_space<vmem>>, %arg2: memref<54x32xf32, #tpu.memory_space<vmem>>, %arg3: memref<1x32xf32, #tpu.memory_space<vmem>>, %arg4: memref<32x16xf32, #tpu.memory_space<vmem>>, %arg5: memref<1x16xf32, #tpu.memory_space<vmem>>, %arg6: memref<1x16xf32, #tpu.memory_space<vmem>>, %arg7: memref<1x1xf32, #tpu.memory_space<vmem>>, %arg8: memref<1x1x8xf32, #tpu.memory_space<vmem>>) attributes {dimension_semantics = [#tpu.dimension_semantics<parallel>], iteration_bounds = array<i64: 1>, scalar_prefetch = 0 : i64, scratch_operands = 0 : i64, tpu.core_type = #tpu.core_type<tc>, window_params = [{transform_indices = @transform_0, window_bounds = array<i64: 8, 54>}, {pipeline_mode = #tpu.pipeline_mode<synchronous>, transform_indices = @transform_1, window_bounds = array<i64: 54, 32>}, {pipeline_mode = #tpu.pipeline_mode<synchronous>, transform_indices = @transform_2, window_bounds = array<i64: 1, 32>}, {pipeline_mode = #tpu.pipeline_mode<synchronous>, transform_indices = @transform_3, window_bounds = array<i64: 32, 16>}, {pipeline_mode = #tpu.pipeline_mode<synchronous>, transform_indices = @transform_4, window_bounds = array<i64: 1, 16>}, {pipeline_mode = #tpu.pipeline_mode<synchronous>, transform_indices = @transform_5, window_bounds = array<i64: 1, 16>}, {pipeline_mode = #tpu.pipeline_mode<synchronous>, transform_indices = @transform_6, window_bounds = array<i64: 1, 1>}, {transform_indices = @transform_7, window_bounds = array<i64: 1, 1, 8>}]} {
    %c0 = arith.constant 0 : index
    %c0_0 = arith.constant 0 : index
    %0 = vector.load %arg1[%c0, %c0_0] : memref<8x54xf32, #tpu.memory_space<vmem>>, vector<8x54xf32>
    %c0_1 = arith.constant 0 : index
    %c0_2 = arith.constant 0 : index
    %1 = vector.load %arg2[%c0_1, %c0_2] : memref<54x32xf32, #tpu.memory_space<vmem>>, vector<54x32xf32>
    %cst = arith.constant dense<0.000000e+00> : vector<8x32xf32>
    %2 = tpu.matmul %0, %1, %cst {dimension_numbers = #tpu.dot_dimension_numbers<[1], [0], [0], [1], [0, 0, 1, 1], [], []>} : vector<8x54xf32>, vector<54x32xf32>, vector<8x32xf32> -> vector<8x32xf32>
    %c0_3 = arith.constant 0 : index
    %c0_4 = arith.constant 0 : index
    %3 = vector.load %arg3[%c0_3, %c0_4] : memref<1x32xf32, #tpu.memory_space<vmem>>, vector<1x32xf32>
    %4 = vector.broadcast %3 : vector<1x32xf32> to vector<8x32xf32>
    %5 = arith.addf %2, %4 : vector<8x32xf32>
    %cst_5 = arith.constant 0.000000e+00 : f32
    %6 = vector.broadcast %cst_5 : f32 to vector<8x32xf32>
    %7 = arith.maximumf %5, %6 : vector<8x32xf32>
    %c0_6 = arith.constant 0 : index
    %c0_7 = arith.constant 0 : index
    %8 = vector.load %arg4[%c0_6, %c0_7] : memref<32x16xf32, #tpu.memory_space<vmem>>, vector<32x16xf32>
    %cst_8 = arith.constant dense<0.000000e+00> : vector<8x16xf32>
    %9 = tpu.matmul %7, %8, %cst_8 {dimension_numbers = #tpu.dot_dimension_numbers<[1], [0], [0], [1], [0, 0, 1, 1], [], []>} : vector<8x32xf32>, vector<32x16xf32>, vector<8x16xf32> -> vector<8x16xf32>
    %c0_9 = arith.constant 0 : index
    %c0_10 = arith.constant 0 : index
    %10 = vector.load %arg5[%c0_9, %c0_10] : memref<1x16xf32, #tpu.memory_space<vmem>>, vector<1x16xf32>
    %11 = vector.broadcast %10 : vector<1x16xf32> to vector<8x16xf32>
    %12 = arith.addf %9, %11 : vector<8x16xf32>
    %cst_11 = arith.constant 0.000000e+00 : f32
    %13 = vector.broadcast %cst_11 : f32 to vector<8x16xf32>
    %14 = arith.maximumf %12, %13 : vector<8x16xf32>
    %c0_12 = arith.constant 0 : index
    %c0_13 = arith.constant 0 : index
    %15 = vector.load %arg6[%c0_12, %c0_13] : memref<1x16xf32, #tpu.memory_space<vmem>>, vector<1x16xf32>
    %cst_14 = arith.constant dense<0.000000e+00> : vector<1x8xf32>
    %16 = tpu.matmul %15, %14, %cst_14 {dimension_numbers = #tpu.dot_dimension_numbers<[1], [1], [0], [0], [0, 0, 1, 0], [], []>} : vector<1x16xf32>, vector<8x16xf32>, vector<1x8xf32> -> vector<1x8xf32>
    %c0_15 = arith.constant 0 : index
    %c0_16 = arith.constant 0 : index
    %17 = vector.load %arg7[%c0_15, %c0_16] : memref<1x1xf32, #tpu.memory_space<vmem>>, vector<1x1xf32>
    %18 = vector.broadcast %17 : vector<1x1xf32> to vector<1x8xf32>
    %19 = arith.addf %16, %18 : vector<1x8xf32>
    %20 = arith.negf %19 : vector<1x8xf32>
    %21 = math.exp %20 : vector<1x8xf32>
    %cst_17 = arith.constant 1.000000e+00 : f32
    %22 = vector.broadcast %cst_17 : f32 to vector<1x8xf32>
    %23 = arith.addf %22, %21 : vector<1x8xf32>
    %24 = arith.divf %22, %23 : vector<1x8xf32>
    %25 = vector.shape_cast %24 : vector<1x8xf32> to vector<1x1x8xf32>
    %c0_18 = arith.constant 0 : index
    %c0_19 = arith.constant 0 : index
    %c0_20 = arith.constant 0 : index
    %26 = vector.load %arg8[%c0_18, %c0_19, %c0_20] : memref<1x1x8xf32, #tpu.memory_space<vmem>>, vector<1x1x8xf32>
    tpu.vector_store %arg8[%c0_18, %c0_19, %c0_20], %25 {strides = array<i32>} : memref<1x1x8xf32, #tpu.memory_space<vmem>>, vector<1x1x8xf32>,
    return
  }
  func.func @transform_0(%arg0: i32) -> (i32, i32) {
    %c0_i32 = arith.constant 0 : i32
    %c0_i32_0 = arith.constant 0 : i32
    return %arg0, %c0_i32 : i32, i32
  }
  func.func @transform_1(%arg0: i32) -> (i32, i32) {
    %c0_i32 = arith.constant 0 : i32
    %c0_i32_0 = arith.constant 0 : i32
    %c0_i32_1 = arith.constant 0 : i32
    return %c0_i32, %c0_i32_0 : i32, i32
  }
  func.func @transform_2(%arg0: i32) -> (i32, i32) {
    %c0_i32 = arith.constant 0 : i32
    %c0_i32_0 = arith.constant 0 : i32
    %c0_i32_1 = arith.constant 0 : i32
    return %c0_i32, %c0_i32_0 : i32, i32
  }
  func.func @transform_3(%arg0: i32) -> (i32, i32) {
    %c0_i32 = arith.constant 0 : i32
    %c0_i32_0 = arith.constant 0 : i32
    %c0_i32_1 = arith.constant 0 : i32
    return %c0_i32, %c0_i32_0 : i32, i32
  }
  func.func @transform_4(%arg0: i32) -> (i32, i32) {
    %c0_i32 = arith.constant 0 : i32
    %c0_i32_0 = arith.constant 0 : i32
    %c0_i32_1 = arith.constant 0 : i32
    return %c0_i32, %c0_i32_0 : i32, i32
  }
  func.func @transform_5(%arg0: i32) -> (i32, i32) {
    %c0_i32 = arith.constant 0 : i32
    %c0_i32_0 = arith.constant 0 : i32
    %c0_i32_1 = arith.constant 0 : i32
    return %c0_i32, %c0_i32_0 : i32, i32
  }
  func.func @transform_6(%arg0: i32) -> (i32, i32) {
    %c0_i32 = arith.constant 0 : i32
    %c0_i32_0 = arith.constant 0 : i32
    %c0_i32_1 = arith.constant 0 : i32
    return %c0_i32, %c0_i32_0 : i32, i32
  }
  func.func @transform_7(%arg0: i32) -> (i32, i32, i32) {
    %c0_i32 = arith.constant 0 : i32
    %c0_i32_0 = arith.constant 0 : i32
    %c0_i32_1 = arith.constant 0 : i32
    return %arg0, %c0_i32, %c0_i32_0 : i32, i32, i32
  }
}

</mosaic_0001>

<bundles_post_ra>
// kernel: tpu_custom_call.1
= control target key start
LH: loop header
LB: loop body
LE: loop exit
PB: predicated region body
PF: predicated region fallthrough
CT: control target
= control target key end

     0   :  { %s532_s0 = inlined_call_operand.vmem [shape: f32[8,54], index: 0, kind: input, shape index: {}]   ;;  %s533_s1 = inlined_call_operand.vmem [shape: f32[54,32], index: 1, kind: input, shape index: {}]   ;;  %s534_s2 = inlined_call_operand.vmem [shape: f32[1,32], index: 2, kind: input, shape index: {}]   ;;  %s535_s3 = inlined_call_operand.vmem [shape: f32[32,16], index: 3, kind: input, shape index: {}]   ;;  %s536_s4 = inlined_call_operand.vmem [shape: f32[1,16], index: 4, kind: input, shape index: {}]   ;;  %s537_s5 = inlined_call_operand.vmem [shape: f32[1,16], index: 5, kind: input, shape index: {}]   ;;  %s538_s6 = inlined_call_operand.<no memory space> [shape: f32[1,1], index: 6, kind: input, shape index: {}]   ;;  %s539_s7 = inlined_call_operand.hbm [shape: f32[1,1,8], index: 7, kind: output, shape index: {}]  }
   0x1   :  { %v12_v0 = vstv %s538_s6 }
   0x2   :  { %13 = vst [vmem:[#allocation2] sm:$0x1] %v12_v0 }
   0x3   :  { %v30_v1 = vld [vmem:[%s533_s1] sm:$0xff]  ;;  %v31_v2 = vld [vmem:[%s533_s1 + $0x8] sm:$0xff]  ;;  %v32_v3 = vld [vmem:[%s533_s1 + $0x10] sm:$0xff]  ;;  %v424_v4 = vmov 0.0|0.0   ;;  %vm425_vm0 = vmmov 0   ;;  %v426_v7 = vmov 0.0  }
   0x4   :  { %375 = vmatprep.subr.bf16.mxu0 %v424_v4  ;;  %v376_v5 = vpack.c.bf16 %v31_v2, %v30_v1  ;;  %v33_v6 = vld [vmem:[%s533_s1 + $0x18] sm:$0xff]  ;;  %384 = vmatprep.subr.bf16.mxu1 %v424_v4  ;;  %v123_v8 = vld [vmem:[%s535_s3] sm:$0xff]  ;;  %v124_v10 = vld [vmem:[%s535_s3 + $0x8] sm:$0xff] }
   0x5   :  { %356 = vmatprep.mubr.msk.f32.mxu0 %vm425_vm0, %v426_v7  ;;  %367 = vmatprep.mubr.msk.f32.mxu1 %vm425_vm0, %v426_v7  ;;  %v379_v9 = vpack.c.bf16 %v33_v6, %v32_v3 }
   0x6   :  { %377 = vmatpush3.bf16.msra.mxu0 %v376_v5 }
   0x7   :  { %14 = vsyncpa [#allocation4], 0  ;;  %378 = vmatprep.subr.bf16.mxu0 %v424_v4  ;;  %v34_v11 = vld [vmem:[%s533_s1 + $0x20] sm:$0xff]  ;;  %v35_v12 = vld [vmem:[%s533_s1 + $0x28] sm:$0xff]  ;;  %v385_v13 = vpack.c.bf16 %v124_v10, %v123_v8  ;;  %vm48_vm1 = vcmask 1045504   ;;  %vm44_vm2 = vcmask 441344   ;;  %v216_v33 = vlaneseq }
   0x8   :  { %v382_v14 = vpack.c.bf16 %v35_v12, %v34_v11  ;;  %v36_v15 = vld [vmem:[%s533_s1 + $0x30] sm:$0x3f]  ;;  %v29_v16 = vld [vmem:[%s532_s0] sm:$0xff]  ;;  %v126_v18 = vld [vmem:[%s535_s3 + $0x18] sm:$0xff]  ;;  %vm134_vm3 = vcmask 261120   ;;  %v427_v26 = vmov 0  }
   0x9   :  { %386 = vmatpush3.bf16.msra.mxu1 %v385_v13  ;;  %v125_v17 = vld [vmem:[%s535_s3 + $0x10] sm:$0xff]  ;;  %v319_v20 = vld [vmem:[%s534_s2] ss:$0 sm:$0xff]  ;;  %395 = vset.pattern.permute.xlu0 %v427_v26  ;;  %vm220_vm4 = vcmask 130048   ;;  %v217_v34 = vshrl.u32 %v216_v33, 7  ;;  %vm303_vm5 = vcmask 57344  }
   0xa   :  { %380 = vmatpush3.bf16.msra.mxu0 %v379_v9  ;;  %387 = vmatprep.subr.bf16.mxu1 %v424_v4  ;;  %v388_v19 = vpack.c.bf16 %v126_v18, %v125_v17  ;;  %v210_v25 = vld [vmem:[#allocation2] sm:$0x1] }
   0xb   :  { %381 = vmatprep.subr.bf16.mxu0 %v424_v4  ;;  %213 = vperm.xlu0 %395, %v210_v25   ;;  %v322_v27 = vld [vmem:[%s536_s4] ss:$0 sm:$0xff]  ;;  %v218_v35 = vsub.s32 0, %v217_v34  ;;  %s428_s4 = smov [#allocation3]  }
   0xc   :  { %v209_v32 = vld [vmem:[%s537_s5] sm:$0x1]  ;;  %s311_s28 = sshll.u32 %s428_s4, 4  ;;  %s312_s28 = int_to_ptr.vmem [resolvable:$true] %s311_s28 }
   0xd   :  { %389 = vmatpush3.bf16.msra.mxu1 %v388_v19  ;;  %s400_s5 = scalar_lea.vmem %s312_s28, 16  ;;  %s404_s29 = scalar_lea.vmem %s312_s28, 32 }
   0xe   :  { %383 = vmatpush3.bf16.msra.mxu0 %v382_v14  ;;  %370 = vmatprep.subr.mxu1 %v426_v7  ;;  %p401_p0 = scmp.ne.s32.totalorder %s312_s28, %s400_s5  ;;  %p405_p1 = scmp.lt.s32.totalorder %s312_s28, %s312_s28 }
   0xf   :  { %354 = vmatprep.subr.mxu0 %v426_v7  ;;  %p406_p2 = scmp.lt.s32.totalorder %s404_s29, %s400_s5 }
  0x11   :  { %p407_p3 = por %p406_p2, %p405_p1 }
  0x12   :  { %355 = vmatpush3.msk.msra.mxu0 %vm48_vm1, %v36_v15 }
  0x13   :  { %357 = vmatmul.mubr.msk.f32.vlgmr.msra.gmra.mrb[0].mxu0 %vm44_vm2, %v29_v16  ;;  %p408_p4 = pnand %p407_p3, %p401_p0 }
  0x8a   :  { %v214_v36 = vpop.permute.xlu0 %213 }
  0x8b   :  { %v219_v37 = vrot.slane %v214_v36, %v218_v35 }
  0xe6   :  { %v118_v21 = vpop.f32.mrb[0].mxu0 }
  0xe7   :  { %v119_v22 = vadd.f32 %v319_v20, %v118_v21  ;;  %v358_v23 = vpop.f32.mrb[1].mxu0 }
  0xe9   :  { %v122_v24 = vmax.f32 %v119_v22, 0.0 }
  0xeb   :  { %368 = vmatmul.mubr.msk.f32.vlgmr.msra.gmra.mrb[0].mxu1 %vm134_vm3, %v122_v24 }
  0xec   :  { %372 = vmatprep.mubr.msk.f32.mxu1 %vm425_vm0, %v426_v7 }
 0x1be   :  { %v204_v28 = vpop.f32.mrb[0].mxu1 }
 0x1bf   :  { %v205_v29 = vadd.f32 %v322_v27, %v204_v28  ;;  %v369_v30 = vpop.f32.mrb[1].mxu1 }
 0x1c1   :  { %v208_v31 = vmax.f32 %v205_v29, 0.0 }
 0x1c3   :  { %371 = vmatpush3.xpose.msk.msra.mxu1 %vm220_vm4, %v208_v31 }
 0x1c6   :  { %373 = vmatmul.mubr.msk.f32.vlgmr.msra.gmra.mrb[2].mxu1 %vm220_vm4, %v209_v32 }
 0x299   :  { %v293_v38 = vpop.f32.mrb[2].mxu1 }
 0x29a   :  { %v294_v39 = vadd.f32 %v293_v38, %v219_v37  ;;  %v374_v40 = vpop.f32.mrb[3].mxu1 }
 0x29c   :  { %v326_v41 = vmul.f32 -1.442695, %v294_v39 }
 0x29e   :  { %396 = vpow2.f32 %v326_v41 }
 0x2a8   :  { %v397_v42 = vpop.eup %396 }
 0x2a9   :  { %v300_v43 = vadd.f32 1.0, %v397_v42 }
 0x2ab   :  { %398 = vrcp.f32 %v300_v43 }
 0x2b5   :  { %v399_v44 = vpop.eup %398 }
 0x2b6   :  { %304 = vst.msk [vmem:[#allocation3] sm:$0x1] %vm303_vm5, %v399_v44 }
 0x2b7   :  { %411 = shalt.err (!%p408_p4)
}
 0x2b8   :  { %s412_s9 = scalar_lea.hbm %s539_s7, 16 }
 0x2b9   :  { %p413_p5 = scmp.ne.s32.totalorder %s539_s7, %s412_s9  ;;  %p416_p6 = scmp.lt.u32.totalorder %s412_s9, %s539_s7 }
 0x2bb   :  { %p418_p7 = pnand %p416_p6, %p413_p5 }
 0x2bd   :  { %421 = shalt.err (!%p418_p7)
}
 0x2be   :  { %314 = dma.vmem_to_hbm [thread:$0]  %s312_s28, 16, %s539_s7, [#allocation4]  }
 0x2bf   :  { %422 = dma.done.wait [#allocation4], 16  }
 0x2c0   :  { %423 = vsyncadd [#allocation4], 4294967280 }
 0x2c1   :  { %318 = vsyncpa [#allocation4], 1 }

</bundles_post_ra>
